<compile_context>
chip_gen: v7x
topology: tpu7x:2x2x1
jax: 0.10.0
libtpu: 0.0.40
codegen_flags: <defaults>
</compile_context>

<pallas_src>
import jax
import jax.numpy as jnp
from jax.experimental import pallas as pl
from jax.experimental.pallas import tpu as pltpu

LANE = 128


def _round_up(x, m):
    return ((x + m - 1) // m) * m


# ---------------------------------------------------------------------------
# Pallas kernels
# ---------------------------------------------------------------------------
def _conv_relu_kernel(p_ref, w_ref, b_ref, out_ref):
    # p_ref: (TM, 9*Cin) bf16, w_ref: (9*Cin, Cout_pad) bf16,
    # b_ref: (1, Cout_pad) f32, out_ref: (TM, Cout_pad) f32.
    acc = jnp.dot(p_ref[...], w_ref[...], preferred_element_type=jnp.float32)
    acc = acc + b_ref[...]           # f32 epilogue (v5e has no bf16 VPU path)
    out_ref[...] = jnp.maximum(acc, 0.0)


def _proto_head_kernel(support_ref, query_ref, out_ref):
    # support: (C, S, D) f32, query: (Nq, D) f32 -> out: (Nq, C) f32.
    protos = jnp.mean(support_ref[...], axis=1)                 # (C, D)
    q = query_ref[...]                                          # (Nq, D)
    # ||q-p||^2 = ||q||^2 + ||p||^2 - 2 q.p^T  (MXU matmul, no (Nq,C,D) tensor)
    qp = jax.lax.dot_general(q, protos, (((1,), (1,)), ((), ())),
                             preferred_element_type=jnp.float32)  # (Nq, C)
    q2 = jnp.sum(q * q, axis=-1, keepdims=True)                 # (Nq, 1)
    p2 = jnp.sum(protos * protos, axis=-1, keepdims=True)       # (C, 1)
    d2 = q2 + jnp.transpose(p2) - 2.0 * qp                      # (Nq, C)
    # clamp: catastrophic cancellation can make d2 slightly negative.
    out_ref[...] = -jnp.sqrt(jnp.maximum(d2, 0.0))


# ---------------------------------------------------------------------------
# Wrappers
# ---------------------------------------------------------------------------
def conv3x3_relu_flat(x_nchw, w, b, *, tm=512):
    """3x3 'same' conv + ReLU as a tiled im2col matmul.

    x: (N, Cin, H, W), w: (Cout, Cin, 3, 3), b: (Cout,)
    Returns per-sample embeddings flattened in NHWC order: (N, H*W*Cout) f32.
    """
    N, Cin, H, W = x_nchw.shape
    Cout = w.shape[0]
    Cout_pad = _round_up(Cout, LANE)        # lane-dense output (no vst.msk)
    K = 9 * Cin

    # im2col in bf16 (halves HBM bytes of the inflated patches matrix).
    # TODO(synk): tap construction still materializes the 9x patches matrix in
    # HBM; moving it in-kernel (9 shifted matmuls from a padded NHWC tile)
    # would cut conv DMA bytes further.
    x = jnp.transpose(x_nchw, (0, 2, 3, 1)).astype(jnp.bfloat16)   # NHWC
    xp = jnp.pad(x, ((0, 0), (1, 1), (1, 1), (0, 0)))
    taps = [xp[:, kh:kh + H, kw:kw + W, :]
            for kh in range(3) for kw in range(3)]                 # 9 x (N,H,W,Cin)
    patches = jnp.stack(taps, axis=3).reshape(N * H * W, K)        # (M, 9*Cin)

    M = N * H * W
    # Tile rows: multiple of 128 (v5e 4x128 MXU geometry). Per-block VMEM
    # (bf16 in + f32 out, x2 double-buffer) stays far below the 32 MiB scoped
    # budget, which is also v7x(64 MiB physical)-safe.
    tm = min(tm, _round_up(M, LANE))
    M_pad = _round_up(M, tm)
    if M_pad != M:
        patches = jnp.pad(patches, ((0, M_pad - M), (0, 0)))

    # weights ordered (kh, kw, cin) x cout, zero-padded to 128 output lanes.
    w_mat = jnp.transpose(w, (2, 3, 1, 0)).reshape(K, Cout)
    w_mat = jnp.pad(w_mat, ((0, 0), (0, Cout_pad - Cout))).astype(jnp.bfloat16)
    b_mat = jnp.pad(b, (0, Cout_pad - Cout)).reshape(1, Cout_pad).astype(jnp.float32)

    out = pl.pallas_call(
        _conv_relu_kernel,
        out_shape=jax.ShapeDtypeStruct((M_pad, Cout_pad), jnp.float32),
        grid=(M_pad // tm,),
        in_specs=[
            pl.BlockSpec((tm, K), lambda i: (i, 0)),           # streamed tiles
            pl.BlockSpec((K, Cout_pad), lambda i: (0, 0)),     # resident weights
            pl.BlockSpec((1, Cout_pad), lambda i: (0, 0)),     # resident bias
        ],
        out_specs=pl.BlockSpec((tm, Cout_pad), lambda i: (i, 0)),
        compiler_params=pltpu.CompilerParams(
            dimension_semantics=("parallel",),      # shard tiles across TCs (v7x)
            vmem_limit_bytes=32 * 1024 * 1024,
        ),
    )(patches, w_mat, b_mat)

    # drop row padding + zero channel padding, flatten in NHWC order.
    feat = out[:M].reshape(N, H, W, Cout_pad)[..., :Cout]
    return feat.reshape(N, H * W * Cout)


def protonet_forward(support_set, query_set, params, num_classes):
    """support_set: (num_classes*n_shot, C, H, W), query_set: (Nq, C, H, W)."""
    n_support = support_set.shape[0]
    n_query = query_set.shape[0]

    # Single conv call for support + query: weights live in VMEM once and the
    # longer M dimension keeps the pipeline in steady state.
    x_all = jnp.concatenate([support_set, query_set], axis=0)
    emb = conv3x3_relu_flat(x_all, params["w"], params["b"])   # (Ns+Nq, D) f32

    D = emb.shape[1]
    support_emb = emb[:n_support].reshape(num_classes, n_support // num_classes, D)
    query_emb = emb[n_support:]

    out = pl.pallas_call(
        _proto_head_kernel,
        out_shape=jax.ShapeDtypeStruct((n_query, num_classes), jnp.float32),
        grid=(1,),
        in_specs=[
            pl.BlockSpec(support_emb.shape, lambda i: (0, 0, 0)),
            pl.BlockSpec((n_query, D), lambda i: (0, 0)),
        ],
        out_specs=pl.BlockSpec((n_query, num_classes), lambda i: (0, 0)),
    )(support_emb, query_emb)
    return out


# ---------------------------------------------------------------------------
if __name__ == "__main__":
    key = jax.random.PRNGKey(0)
    k_w, k_b, k_s, k_q = jax.random.split(key, 4)

    num_classes = 2
    n_shot = 2
    n_query = 6
    Cin, hidden, H, W = 4, 8, 16, 16

    params = {
        "w": 0.1 * jax.random.normal(k_w, (hidden, Cin, 3, 3), jnp.float32),
        "b": 0.05 * jax.random.normal(k_b, (hidden,), jnp.float32),
    }

    support_set = jax.random.normal(k_s, (num_classes * n_shot, Cin, H, W), jnp.float32)
    query_set = jax.random.normal(k_q, (n_query, Cin, H, W), jnp.float32)

    logits = jax.jit(protonet_forward, static_argnums=(3,))(
        support_set, query_set, params, num_classes
    )
    jax.block_until_ready(logits)

    assert logits.shape == (n_query, num_classes)
    assert bool(jnp.all(jnp.isfinite(logits)))
    assert bool(jnp.all(logits <= 0.0))  # negative Euclidean distances
    print("KERNEL_OK")
</pallas_src>

<mosaic_0001>
module attributes {stable_mosaic.version = 11 : i64} {
  func.func @_conv_relu_kernel(%arg0: i32, %arg1: memref<512x36xbf16, #tpu.memory_space<vmem>>, %arg2: memref<36x128xbf16, #tpu.memory_space<vmem>>, %arg3: memref<1x128xf32, #tpu.memory_space<vmem>>, %arg4: memref<512x128xf32, #tpu.memory_space<vmem>>) attributes {dimension_semantics = [#tpu.dimension_semantics<parallel>], iteration_bounds = array<i64: 5>, scalar_prefetch = 0 : i64, scratch_operands = 0 : i64, tpu.core_type = #tpu.core_type<tc>, window_params = [{transform_indices = @transform_0, window_bounds = array<i64: 512, 36>}, {pipeline_mode = #tpu.pipeline_mode<synchronous>, transform_indices = @transform_1, window_bounds = array<i64: 36, 128>}, {pipeline_mode = #tpu.pipeline_mode<synchronous>, transform_indices = @transform_2, window_bounds = array<i64: 1, 128>}, {transform_indices = @transform_3, window_bounds = array<i64: 512, 128>}]} {
    %c0 = arith.constant 0 : index
    %c0_0 = arith.constant 0 : index
    %0 = vector.load %arg1[%c0, %c0_0] : memref<512x36xbf16, #tpu.memory_space<vmem>>, vector<512x36xbf16>
    %c0_1 = arith.constant 0 : index
    %c0_2 = arith.constant 0 : index
    %1 = vector.load %arg2[%c0_1, %c0_2] : memref<36x128xbf16, #tpu.memory_space<vmem>>, vector<36x128xbf16>
    %cst = arith.constant dense<0.000000e+00> : vector<512x128xf32>
    %2 = tpu.matmul %0, %1, %cst {dimension_numbers = #tpu.dot_dimension_numbers<[1], [0], [0], [1], [0, 0, 1, 1], [], []>} : vector<512x36xbf16>, vector<36x128xbf16>, vector<512x128xf32> -> vector<512x128xf32>
    %c0_3 = arith.constant 0 : index
    %c0_4 = arith.constant 0 : index
    %3 = vector.load %arg3[%c0_3, %c0_4] : memref<1x128xf32, #tpu.memory_space<vmem>>, vector<1x128xf32>
    %4 = vector.broadcast %3 : vector<1x128xf32> to vector<512x128xf32>
    %5 = arith.addf %2, %4 : vector<512x128xf32>
    %cst_5 = arith.constant 0.000000e+00 : f32
    %6 = vector.broadcast %cst_5 : f32 to vector<512x128xf32>
    %7 = arith.maximumf %5, %6 : vector<512x128xf32>
    %c0_6 = arith.constant 0 : index
    %c0_7 = arith.constant 0 : index
    %8 = vector.load %arg4[%c0_6, %c0_7] : memref<512x128xf32, #tpu.memory_space<vmem>>, vector<512x128xf32>
    tpu.vector_store %arg4[%c0_6, %c0_7], %7 {strides = array<i32>} : memref<512x128xf32, #tpu.memory_space<vmem>>, vector<512x128xf32>,
    return
  }
  func.func @transform_0(%arg0: i32) -> (i32, i32) {
    %c0_i32 = arith.constant 0 : i32
    %c0_i32_0 = arith.constant 0 : i32
    return %arg0, %c0_i32 : i32, i32
  }
  func.func @transform_1(%arg0: i32) -> (i32, i32) {
    %c0_i32 = arith.constant 0 : i32
    %c0_i32_0 = arith.constant 0 : i32
    %c0_i32_1 = arith.constant 0 : i32
    return %c0_i32, %c0_i32_0 : i32, i32
  }
  func.func @transform_2(%arg0: i32) -> (i32, i32) {
    %c0_i32 = arith.constant 0 : i32
    %c0_i32_0 = arith.constant 0 : i32
    %c0_i32_1 = arith.constant 0 : i32
    return %c0_i32, %c0_i32_0 : i32, i32
  }
  func.func @transform_3(%arg0: i32) -> (i32, i32) {
    %c0_i32 = arith.constant 0 : i32
    %c0_i32_0 = arith.constant 0 : i32
    return %arg0, %c0_i32 : i32, i32
  }
}

module attributes {stable_mosaic.version = 11 : i64} {
  func.func @_proto_head_kernel(%arg0: i32, %arg1: memref<2x2x2048xf32, #tpu.memory_space<vmem>>, %arg2: memref<6x2048xf32, #tpu.memory_space<vmem>>, %arg3: memref<6x2xf32, #tpu.memory_space<vmem>>) attributes {dimension_semantics = [#tpu.dimension_semantics<arbitrary>], iteration_bounds = array<i64: 1>, scalar_prefetch = 0 : i64, scratch_operands = 0 : i64, tpu.core_type = #tpu.core_type<tc>, window_params = [{pipeline_mode = #tpu.pipeline_mode<synchronous>, transform_indices = @transform_0, window_bounds = array<i64: 2, 2, 2048>}, {pipeline_mode = #tpu.pipeline_mode<synchronous>, transform_indices = @transform_1, window_bounds = array<i64: 6, 2048>}, {pipeline_mode = #tpu.pipeline_mode<synchronous>, transform_indices = @transform_2, window_bounds = array<i64: 6, 2>}]} {
    %c0 = arith.constant 0 : index
    %c0_0 = arith.constant 0 : index
    %c0_1 = arith.constant 0 : index
    %0 = vector.load %arg1[%c0, %c0_0, %c0_1] : memref<2x2x2048xf32, #tpu.memory_space<vmem>>, vector<2x2x2048xf32>
    %cst = arith.constant dense<0.000000e+00> : vector<2x2048xf32>
    %1 = vector.multi_reduction <add>, %0, %cst [1] : vector<2x2x2048xf32> to vector<2x2048xf32>
    %cst_2 = arith.constant 2.000000e+00 : f32
    %2 = vector.broadcast %cst_2 : f32 to vector<2x2048xf32>
    %3 = arith.divf %1, %2 : vector<2x2048xf32>
    %c0_3 = arith.constant 0 : index
    %c0_4 = arith.constant 0 : index
    %4 = vector.load %arg2[%c0_3, %c0_4] : memref<6x2048xf32, #tpu.memory_space<vmem>>, vector<6x2048xf32>
    %cst_5 = arith.constant dense<0.000000e+00> : vector<6x2xf32>
    %5 = tpu.matmul %4, %3, %cst_5 {dimension_numbers = #tpu.dot_dimension_numbers<[1], [1], [0], [0], [0, 0, 1, 0], [], []>} : vector<6x2048xf32>, vector<2x2048xf32>, vector<6x2xf32> -> vector<6x2xf32>
    %6 = arith.mulf %4, %4 : vector<6x2048xf32>
    %cst_6 = arith.constant dense<0.000000e+00> : vector<6xf32>
    %7 = vector.multi_reduction <add>, %6, %cst_6 [1] : vector<6x2048xf32> to vector<6xf32>
    %8 = vector.shape_cast %7 : vector<6xf32> to vector<6x1xf32>
    %9 = arith.mulf %3, %3 : vector<2x2048xf32>
    %cst_7 = arith.constant dense<0.000000e+00> : vector<2xf32>
    %10 = vector.multi_reduction <add>, %9, %cst_7 [1] : vector<2x2048xf32> to vector<2xf32>
    %11 = vector.shape_cast %10 : vector<2xf32> to vector<2x1xf32>
    %12 = tpu.transpose %11, [1, 0] : vector<2x1xf32> -> vector<1x2xf32>
    %13 = vector.broadcast %8 : vector<6x1xf32> to vector<6x2xf32>
    %14 = vector.broadcast %12 : vector<1x2xf32> to vector<6x2xf32>
    %15 = arith.addf %13, %14 : vector<6x2xf32>
    %cst_8 = arith.constant 2.000000e+00 : f32
    %16 = vector.broadcast %cst_8 : f32 to vector<6x2xf32>
    %17 = arith.mulf %16, %5 : vector<6x2xf32>
    %18 = arith.subf %15, %17 : vector<6x2xf32>
    %cst_9 = arith.constant 0.000000e+00 : f32
    %19 = vector.broadcast %cst_9 : f32 to vector<6x2xf32>
    %20 = arith.maximumf %18, %19 : vector<6x2xf32>
    %21 = math.sqrt %20 : vector<6x2xf32>
    %cst_10 = arith.constant 0.000000e+00 : f32
    %22 = vector.broadcast %cst_10 : f32 to vector<6x2xf32>
    %23 = arith.subf %22, %21 : vector<6x2xf32>
    %c0_11 = arith.constant 0 : index
    %c0_12 = arith.constant 0 : index
    %24 = vector.load %arg3[%c0_11, %c0_12] : memref<6x2xf32, #tpu.memory_space<vmem>>, vector<6x2xf32>
    tpu.vector_store %arg3[%c0_11, %c0_12], %23 {strides = array<i32>} : memref<6x2xf32, #tpu.memory_space<vmem>>, vector<6x2xf32>,
    return
  }
  func.func @transform_0(%arg0: i32) -> (i32, i32, i32) {
    %c0_i32 = arith.constant 0 : i32
    %c0_i32_0 = arith.constant 0 : i32
    %c0_i32_1 = arith.constant 0 : i32
    %c0_i32_2 = arith.constant 0 : i32
    return %c0_i32, %c0_i32_0, %c0_i32_1 : i32, i32, i32
  }
  func.func @transform_1(%arg0: i32) -> (i32, i32) {
    %c0_i32 = arith.constant 0 : i32
    %c0_i32_0 = arith.constant 0 : i32
    %c0_i32_1 = arith.constant 0 : i32
    return %c0_i32, %c0_i32_0 : i32, i32
  }
  func.func @transform_2(%arg0: i32) -> (i32, i32) {
    %c0_i32 = arith.constant 0 : i32
    %c0_i32_0 = arith.constant 0 : i32
    %c0_i32_1 = arith.constant 0 : i32
    return %c0_i32, %c0_i32_0 : i32, i32
  }
}

</mosaic_0001>

<bundles_post_ra>
// kernel: protonet_forward.2
= control target key start
LH: loop header
LB: loop body
LE: loop exit
PB: predicated region body
PF: predicated region fallthrough
CT: control target
= control target key end

     0   :  { %s1263_s12 = smov 0   ;;  %s1494_s0 = inlined_call_operand.vmem [shape: bf16[2560,36], index: 0, kind: input, shape index: {}]   ;;  %s1495_s1 = inlined_call_operand.vmem [shape: bf16[36,128], index: 1, kind: input, shape index: {}]   ;;  %s1496_s2 = inlined_call_operand.vmem [shape: f32[1,128], index: 2, kind: input, shape index: {}]   ;;  %s1497_s3 = inlined_call_operand.vmem [shape: f32[2560,128], index: 3, kind: output, shape index: {}]  }
   0x1 LB: > { %s1000_s13 = sadd.s32 4294967295, %s1241_s12   ;;  %p1004_p0 = scmp.ge.s32.totalorder %s1241_s12, 1  ;;  %s1241_s12 = sphi %s1263_s12, %s13_s12  }
   0x2   : > { %p138_p1 = scmp.lt.s32.totalorder %s1241_s12, 6 }
   0x4   : > { %p139_p2 = pnand %p1004_p0, %p138_p1 }
   0x5   : > { %v1200_v0 = vld [vmem:[%s1495_s1] sm:$0xff] (!%p139_p2)   ;;  %v1201_v1 = vld [vmem:[%s1495_s1 + $0x8] sm:$0xff] (!%p139_p2)   ;;  %s1005_s18 = sshll.u32 (!%p139_p2), %s1000_s13, 6  ;;  %v1202_v2 = vld [vmem:[%s1495_s1 + $0x10] ss:$0 sps:$4 sm:$0x33] (!%p139_p2)  }
   0x6   : > { %142 = sbr.rel (%p139_p2) target bundleno = 295 (0x127), region = 32  ;;  %1114 = vmatprep.subr.bf16.mxu0 (!%p139_p2), %v1200_v0  ;;  %1184 = vmatprep.subr.bf16.mxu1 (!%p139_p2), %v1200_v0  ;;  %p163_p3 = scmp.lt.s32.totalorder (!%p139_p2), %s1005_s18, 319  ;;  %vm523_vm0 = vcmask (!%p139_p2), 1041408   ;;  %vm426_vm1 = vcmask (!%p139_p2), 293888   ;;  %v1355_v36 = vld [vmem:[%s1496_s2] ss:$0 sm:$0xff] (!%p139_p2) }
   0x7   : > { %1115 = vmatpush3.bf16.msra.mxu0 (!%p139_p2), %v1200_v0  ;;  %1187 = vmatpush3.bf16.msra.mxu1 (!%p139_p2), %v1200_v0  ;;  %v525_v3 = vsel (!%p139_p2), %vm523_vm0, %v1202_v2, 0 }
   0x8   : > { %1116 = vmatprep.subr.bf16.mxu0 (!%p139_p2), %v1201_v1  ;;  %1185 = vmatprep.subr.bf16.mxu1 (!%p139_p2), %v1201_v1 }
   0xb   : > { %1117 = vmatpush3.bf16.msra.mxu0 (!%p139_p2), %v1201_v1  ;;  %1188 = vmatpush3.bf16.msra.mxu1 (!%p139_p2), %v1201_v1 }
   0xc   : > { %1190 = vmatprep.subr.msk.bf16.mxu0 (!%p139_p2), %vm523_vm0, %v1202_v2  ;;  %1191 = vmatprep.subr.msk.bf16.mxu1 (!%p139_p2), %vm523_vm0, %v1202_v2 }
   0xd   : > { %s1499_s18 = smov (!%p163_p3, %s1005_s18), 319 }
   0xe   : > { %s1006_s21 = sshll.u32 %s1499_s18, 2  ;;  %s1008_s27 = sshll.u32 %s1499_s18, 3 }
   0xf   : > { %s1286_s24 = scalar_lea.vmem %s1494_s0, %s1006_s21  ;;  %1119 = vmatpush3.bf16.msra.mxu0 %v525_v3  ;;  %1189 = vmatpush3.bf16.msra.mxu1 %v525_v3  ;;  %s1363_s30 = scalar_lea.vmem %s1497_s3, %s1008_s27 }
  0x10   : > { %v1203_v4 = vld [vmem:[%s1286_s24] sm:$0xff]   ;;  %v1205_v6 = vld [vmem:[%s1286_s24 + $0x8] sm:$0xff]   ;;  %v1207_v8 = vld [vmem:[%s1286_s24 + $0x10] sm:$0xff]  }
  0x11   : > { %v1204_v5 = vld [vmem:[%s1286_s24 + $0x80] sm:$0xff]   ;;  %1120 = vmatprep.mubr.msk.bf16.mxu0 %vm426_vm1, %v1203_v4  ;;  %v1206_v7 = vld [vmem:[%s1286_s24 + $0x88] sm:$0xff]   ;;  %v1208_v9 = vld [vmem:[%s1286_s24 + $0x90] sm:$0xff]  }
  0x12   : > { %1152 = vmatprep.mubr.msk.bf16.mxu1 %vm426_vm1, %v1204_v5  ;;  %1121 = vmatmul.mubr.msk.bf16.vlgmr.msra.gmra.mrb[0].mxu0 %vm426_vm1, %v1205_v6  ;;  %v1209_v10 = vld [vmem:[%s1286_s24 + $0x18] sm:$0xff]   ;;  %v1211_v12 = vld [vmem:[%s1286_s24 + $0x20] sm:$0xff]   ;;  %v1213_v14 = vld [vmem:[%s1286_s24 + $0x28] sm:$0xff]  }
  0x13   : > { %1153 = vmatmul.mubr.msk.bf16.vlgmr.msra.gmra.mrb[0].mxu1 %vm426_vm1, %v1206_v7  ;;  %1124 = vmatprep.mubr.msk.bf16.mxu0 %vm426_vm1, %v1207_v8  ;;  %v1210_v11 = vld [vmem:[%s1286_s24 + $0x98] sm:$0xff]   ;;  %v1212_v13 = vld [vmem:[%s1286_s24 + $0xa0] sm:$0xff]   ;;  %v1214_v15 = vld [vmem:[%s1286_s24 + $0xa8] sm:$0xff]  }
  0x14   : > { %1156 = vmatprep.mubr.msk.bf16.mxu1 %vm426_vm1, %v1208_v9  ;;  %v1215_v16 = vld [vmem:[%s1286_s24 + $0x30] sm:$0xff]   ;;  %v1217_v18 = vld [vmem:[%s1286_s24 + $0x38] sm:$0xff]   ;;  %v1219_v20 = vld [vmem:[%s1286_s24 + $0x40] sm:$0xff]  }
  0x15   : > { %v1216_v17 = vld [vmem:[%s1286_s24 + $0xb0] sm:$0xff]   ;;  %v1218_v19 = vld [vmem:[%s1286_s24 + $0xb8] sm:$0xff]   ;;  %v1220_v21 = vld [vmem:[%s1286_s24 + $0xc0] sm:$0xff]  }
  0x16   : > { %v1221_v22 = vld [vmem:[%s1286_s24 + $0x48] sm:$0xff]   ;;  %v1223_v24 = vld [vmem:[%s1286_s24 + $0x50] sm:$0xff]   ;;  %v1225_v26 = vld [vmem:[%s1286_s24 + $0x58] sm:$0xff]  }
  0x17   : > { %v1222_v23 = vld [vmem:[%s1286_s24 + $0xc8] sm:$0xff]   ;;  %v1224_v25 = vld [vmem:[%s1286_s24 + $0xd0] sm:$0xff]   ;;  %v1226_v27 = vld [vmem:[%s1286_s24 + $0xd8] sm:$0xff]  }
  0x18   : > { %v1227_v28 = vld [vmem:[%s1286_s24 + $0x60] sm:$0xff]   ;;  %v1229_v30 = vld [vmem:[%s1286_s24 + $0x68] sm:$0xff]   ;;  %v1231_v32 = vld [vmem:[%s1286_s24 + $0x70] sm:$0xff]  }
  0x19   : > { %v1228_v29 = vld [vmem:[%s1286_s24 + $0xe0] sm:$0xff]   ;;  %v1230_v31 = vld [vmem:[%s1286_s24 + $0xe8] sm:$0xff]   ;;  %v1232_v33 = vld [vmem:[%s1286_s24 + $0xf0] sm:$0xff]  }
  0x1a   : > { %1125 = vmatmul.mubr.msk.bf16.gmra.mrb[4].mxu0 %vm426_vm1, %v1209_v10  ;;  %v1233_v34 = vld [vmem:[%s1286_s24 + $0x78] sm:$0xff]  }
  0x1b   : > { %1157 = vmatmul.mubr.msk.bf16.gmra.mrb[4].mxu1 %vm426_vm1, %v1210_v11  ;;  %1128 = vmatprep.mubr.msk.bf16.mxu0 %vm426_vm1, %v1211_v12  ;;  %v1234_v35 = vld [vmem:[%s1286_s24 + $0xf8] sm:$0xff]  }
  0x1c   : > { %1160 = vmatprep.mubr.msk.bf16.mxu1 %vm426_vm1, %v1212_v13 }
  0x22   : > { %1129 = vmatmul.mubr.msk.bf16.gmra.mrb[8].mxu0 %vm426_vm1, %v1213_v14 }
  0x23   : > { %1161 = vmatmul.mubr.msk.bf16.gmra.mrb[8].mxu1 %vm426_vm1, %v1214_v15  ;;  %1132 = vmatprep.mubr.msk.bf16.mxu0 %vm426_vm1, %v1215_v16 }
  0x24   : > { %1164 = vmatprep.mubr.msk.bf16.mxu1 %vm426_vm1, %v1216_v17 }
  0x2a   : > { %1133 = vmatmul.mubr.msk.bf16.gmra.mrb[12].mxu0 %vm426_vm1, %v1217_v18 }
  0x2b   : > { %1165 = vmatmul.mubr.msk.bf16.gmra.mrb[12].mxu1 %vm426_vm1, %v1218_v19  ;;  %1136 = vmatprep.mubr.msk.bf16.mxu0 %vm426_vm1, %v1219_v20 }
  0x2c   : > { %1168 = vmatprep.mubr.msk.bf16.mxu1 %vm426_vm1, %v1220_v21 }
  0x32   : > { %1137 = vmatmul.mubr.msk.bf16.gmra.mrb[16].mxu0 %vm426_vm1, %v1221_v22 }
  0x33   : > { %1169 = vmatmul.mubr.msk.bf16.gmra.mrb[16].mxu1 %vm426_vm1, %v1222_v23  ;;  %1140 = vmatprep.mubr.msk.bf16.mxu0 %vm426_vm1, %v1223_v24 }
  0x34   : > { %1172 = vmatprep.mubr.msk.bf16.mxu1 %vm426_vm1, %v1224_v25 }
  0x3a   : > { %1141 = vmatmul.mubr.msk.bf16.gmra.mrb[20].mxu0 %vm426_vm1, %v1225_v26 }
  0x3b   : > { %1173 = vmatmul.mubr.msk.bf16.gmra.mrb[20].mxu1 %vm426_vm1, %v1226_v27  ;;  %1144 = vmatprep.mubr.msk.bf16.mxu0 %vm426_vm1, %v1227_v28 }
  0x3c   : > { %1176 = vmatprep.mubr.msk.bf16.mxu1 %vm426_vm1, %v1228_v29 }
  0x42   : > { %1145 = vmatmul.mubr.msk.bf16.gmra.mrb[24].mxu0 %vm426_vm1, %v1229_v30 }
  0x43   : > { %1177 = vmatmul.mubr.msk.bf16.gmra.mrb[24].mxu1 %vm426_vm1, %v1230_v31  ;;  %1148 = vmatprep.mubr.msk.bf16.mxu0 %vm426_vm1, %v1231_v32 }
  0x44   : > { %1180 = vmatprep.mubr.msk.bf16.mxu1 %vm426_vm1, %v1232_v33 }
  0x4a   : > { %1149 = vmatmul.mubr.msk.bf16.gmra.mrb[28].mxu0 %vm426_vm1, %v1233_v34 }
  0x4b   : > { %1181 = vmatmul.mubr.msk.bf16.gmra.mrb[28].mxu1 %vm426_vm1, %v1234_v35 }
  0xe5   : > { %v1122_v37 = vpop.f32.mrb[0].mxu0 }
  0xe6   : > { %v1154_v38 = vpop.f32.mrb[0].mxu1  ;;  %v570_v39 = vadd.f32 %v1122_v37, %v1355_v36  ;;  %v561_v41 = vpop.f32.mrb[1].mxu0 }
  0xe7   : > { %v698_v40 = vadd.f32 %v1154_v38, %v1355_v36  ;;  %v689_v42 = vpop.f32.mrb[1].mxu1  ;;  %v562_v43 = vadd.f32 %v1355_v36, %v561_v41  ;;  %v1123_v45 = vpop.f32.mrb[2].mxu0 }
  0xe8   : > { %v690_v44 = vadd.f32 %v1355_v36, %v689_v42  ;;  %v1155_v46 = vpop.f32.mrb[2].mxu1  ;;  %v818_v47 = vmax.f32 %v570_v39, 0.0  ;;  %v573_v49 = vadd.f32 %v1123_v45, %v1355_v36  ;;  %v564_v51 = vpop.f32.mrb[3].mxu0 }
  0xe9   : > { %v850_v48 = vmax.f32 %v698_v40, 0.0  ;;  %v701_v50 = vadd.f32 %v1155_v46, %v1355_v36  ;;  %v692_v52 = vpop.f32.mrb[3].mxu1  ;;  %v816_v53 = vmax.f32 %v562_v43, 0.0  ;;  %v565_v55 = vadd.f32 %v1355_v36, %v564_v51 }
  0xea   : > { %v848_v54 = vmax.f32 %v690_v44, 0.0  ;;  %v693_v56 = vadd.f32 %v1355_v36, %v692_v52  ;;  %882 = vst [vmem:[%s1363_s30 + $0x10] sm:$0xff] %v818_v47  ;;  %v819_v57 = vmax.f32 %v573_v49, 0.0 }
  0xeb   : > { %914 = vst [vmem:[%s1363_s30 + $0x110] sm:$0xff] %v850_v48  ;;  %v851_v58 = vmax.f32 %v701_v50, 0.0  ;;  %880 = vst [vmem:[%s1363_s30] sm:$0xff] %v816_v53  ;;  %v817_v59 = vmax.f32 %v565_v55, 0.0 }
  0xec   : > { %912 = vst [vmem:[%s1363_s30 + $0x100] sm:$0xff] %v848_v54  ;;  %v849_v60 = vmax.f32 %v693_v56, 0.0  ;;  %883 = vst [vmem:[%s1363_s30 + $0x18] sm:$0xff] %v819_v57 }
  0xed   : > { %915 = vst [vmem:[%s1363_s30 + $0x118] sm:$0xff] %v851_v58  ;;  %881 = vst [vmem:[%s1363_s30 + $0x8] sm:$0xff] %v817_v59  ;;  %v1126_v61 = vpop.f32.mrb[4].mxu0 }
  0xee   : > { %913 = vst [vmem:[%s1363_s30 + $0x108] sm:$0xff] %v849_v60  ;;  %v1158_v62 = vpop.f32.mrb[4].mxu1  ;;  %v586_v63 = vadd.f32 %v1126_v61, %v1355_v36  ;;  %v577_v1 = vpop.f32.mrb[5].mxu0 }
  0xef   : > { %v714_v0 = vadd.f32 %v1158_v62, %v1355_v36  ;;  %v705_v2 = vpop.f32.mrb[5].mxu1  ;;  %v578_v3 = vadd.f32 %v1355_v36, %v577_v1  ;;  %v1127_v5 = vpop.f32.mrb[6].mxu0 }
  0xf0   : > { %v706_v4 = vadd.f32 %v1355_v36, %v705_v2  ;;  %v1159_v6 = vpop.f32.mrb[6].mxu1  ;;  %v822_v7 = vmax.f32 %v586_v63, 0.0  ;;  %v589_v9 = vadd.f32 %v1127_v5, %v1355_v36  ;;  %v580_v11 = vpop.f32.mrb[7].mxu0 }
  0xf1   : > { %v854_v8 = vmax.f32 %v714_v0, 0.0  ;;  %v717_v10 = vadd.f32 %v1159_v6, %v1355_v36  ;;  %v708_v12 = vpop.f32.mrb[7].mxu1  ;;  %v820_v13 = vmax.f32 %v578_v3, 0.0  ;;  %v581_v15 = vadd.f32 %v1355_v36, %v580_v11 }
  0xf2   : > { %v852_v14 = vmax.f32 %v706_v4, 0.0  ;;  %v709_v16 = vadd.f32 %v1355_v36, %v708_v12  ;;  %886 = vst [vmem:[%s1363_s30 + $0x30] sm:$0xff] %v822_v7  ;;  %v823_v17 = vmax.f32 %v589_v9, 0.0 }
  0xf3   : > { %918 = vst [vmem:[%s1363_s30 + $0x130] sm:$0xff] %v854_v8  ;;  %v855_v18 = vmax.f32 %v717_v10, 0.0  ;;  %884 = vst [vmem:[%s1363_s30 + $0x20] sm:$0xff] %v820_v13  ;;  %v821_v19 = vmax.f32 %v581_v15, 0.0 }
  0xf4   : > { %916 = vst [vmem:[%s1363_s30 + $0x120] sm:$0xff] %v852_v14  ;;  %v853_v20 = vmax.f32 %v709_v16, 0.0  ;;  %887 = vst [vmem:[%s1363_s30 + $0x38] sm:$0xff] %v823_v17 }
  0xf5   : > { %919 = vst [vmem:[%s1363_s30 + $0x138] sm:$0xff] %v855_v18  ;;  %885 = vst [vmem:[%s1363_s30 + $0x28] sm:$0xff] %v821_v19  ;;  %v1130_v21 = vpop.f32.mrb[8].mxu0 }
  0xf6   : > { %917 = vst [vmem:[%s1363_s30 + $0x128] sm:$0xff] %v853_v20  ;;  %v1162_v22 = vpop.f32.mrb[8].mxu1  ;;  %v602_v23 = vadd.f32 %v1130_v21, %v1355_v36  ;;  %v593_v25 = vpop.f32.mrb[9].mxu0 }
  0xf7   : > { %v730_v24 = vadd.f32 %v1162_v22, %v1355_v36  ;;  %v721_v26 = vpop.f32.mrb[9].mxu1  ;;  %v594_v27 = vadd.f32 %v1355_v36, %v593_v25  ;;  %v1131_v29 = vpop.f32.mrb[10].mxu0 }
  0xf8   : > { %v722_v28 = vadd.f32 %v1355_v36, %v721_v26  ;;  %v1163_v30 = vpop.f32.mrb[10].mxu1  ;;  %v826_v31 = vmax.f32 %v602_v23, 0.0  ;;  %v605_v33 = vadd.f32 %v1131_v29, %v1355_v36  ;;  %v596_v35 = vpop.f32.mrb[11].mxu0 }
  0xf9   : > { %v858_v32 = vmax.f32 %v730_v24, 0.0  ;;  %v733_v34 = vadd.f32 %v1163_v30, %v1355_v36  ;;  %v724_v37 = vpop.f32.mrb[11].mxu1  ;;  %v824_v38 = vmax.f32 %v594_v27, 0.0  ;;  %v597_v40 = vadd.f32 %v1355_v36, %v596_v35 }
  0xfa   : > { %v856_v39 = vmax.f32 %v722_v28, 0.0  ;;  %v725_v41 = vadd.f32 %v1355_v36, %v724_v37  ;;  %890 = vst [vmem:[%s1363_s30 + $0x50] sm:$0xff] %v826_v31  ;;  %v827_v42 = vmax.f32 %v605_v33, 0.0 }
  0xfb   : > { %922 = vst [vmem:[%s1363_s30 + $0x150] sm:$0xff] %v858_v32  ;;  %v859_v43 = vmax.f32 %v733_v34, 0.0  ;;  %888 = vst [vmem:[%s1363_s30 + $0x40] sm:$0xff] %v824_v38  ;;  %v825_v44 = vmax.f32 %v597_v40, 0.0 }
  0xfc   : > { %920 = vst [vmem:[%s1363_s30 + $0x140] sm:$0xff] %v856_v39  ;;  %v857_v45 = vmax.f32 %v725_v41, 0.0  ;;  %891 = vst [vmem:[%s1363_s30 + $0x58] sm:$0xff] %v827_v42 }
  0xfd   : > { %923 = vst [vmem:[%s1363_s30 + $0x158] sm:$0xff] %v859_v43  ;;  %889 = vst [vmem:[%s1363_s30 + $0x48] sm:$0xff] %v825_v44  ;;  %v1134_v46 = vpop.f32.mrb[12].mxu0 }
  0xfe   : > { %921 = vst [vmem:[%s1363_s30 + $0x148] sm:$0xff] %v857_v45  ;;  %v1166_v47 = vpop.f32.mrb[12].mxu1  ;;  %v618_v48 = vadd.f32 %v1134_v46, %v1355_v36  ;;  %v609_v50 = vpop.f32.mrb[13].mxu0 }
  0xff   : > { %v746_v49 = vadd.f32 %v1166_v47, %v1355_v36  ;;  %v737_v51 = vpop.f32.mrb[13].mxu1  ;;  %v610_v52 = vadd.f32 %v1355_v36, %v609_v50  ;;  %v1135_v54 = vpop.f32.mrb[14].mxu0 }
 0x100   : > { %v738_v53 = vadd.f32 %v1355_v36, %v737_v51  ;;  %v1167_v55 = vpop.f32.mrb[14].mxu1  ;;  %v830_v56 = vmax.f32 %v618_v48, 0.0  ;;  %v621_v58 = vadd.f32 %v1135_v54, %v1355_v36  ;;  %v612_v60 = vpop.f32.mrb[15].mxu0 }
 0x101   : > { %v862_v57 = vmax.f32 %v746_v49, 0.0  ;;  %v749_v59 = vadd.f32 %v1167_v55, %v1355_v36  ;;  %v740_v61 = vpop.f32.mrb[15].mxu1  ;;  %v828_v62 = vmax.f32 %v610_v52, 0.0  ;;  %v613_v0 = vadd.f32 %v1355_v36, %v612_v60 }
 0x102   : > { %v860_v63 = vmax.f32 %v738_v53, 0.0  ;;  %v741_v1 = vadd.f32 %v1355_v36, %v740_v61  ;;  %894 = vst [vmem:[%s1363_s30 + $0x70] sm:$0xff] %v830_v56  ;;  %v831_v2 = vmax.f32 %v621_v58, 0.0 }
 0x103   : > { %926 = vst [vmem:[%s1363_s30 + $0x170] sm:$0xff] %v862_v57  ;;  %v863_v3 = vmax.f32 %v749_v59, 0.0  ;;  %892 = vst [vmem:[%s1363_s30 + $0x60] sm:$0xff] %v828_v62  ;;  %v829_v4 = vmax.f32 %v613_v0, 0.0 }
 0x104   : > { %924 = vst [vmem:[%s1363_s30 + $0x160] sm:$0xff] %v860_v63  ;;  %v861_v5 = vmax.f32 %v741_v1, 0.0  ;;  %895 = vst [vmem:[%s1363_s30 + $0x78] sm:$0xff] %v831_v2 }
 0x105   : > { %927 = vst [vmem:[%s1363_s30 + $0x178] sm:$0xff] %v863_v3  ;;  %893 = vst [vmem:[%s1363_s30 + $0x68] sm:$0xff] %v829_v4  ;;  %v1138_v6 = vpop.f32.mrb[16].mxu0 }
 0x106   : > { %925 = vst [vmem:[%s1363_s30 + $0x168] sm:$0xff] %v861_v5  ;;  %v1170_v7 = vpop.f32.mrb[16].mxu1  ;;  %v634_v8 = vadd.f32 %v1138_v6, %v1355_v36  ;;  %v625_v10 = vpop.f32.mrb[17].mxu0 }
 0x107   : > { %v762_v9 = vadd.f32 %v1170_v7, %v1355_v36  ;;  %v753_v11 = vpop.f32.mrb[17].mxu1  ;;  %v626_v12 = vadd.f32 %v1355_v36, %v625_v10  ;;  %v1139_v14 = vpop.f32.mrb[18].mxu0 }
 0x108   : > { %v754_v13 = vadd.f32 %v1355_v36, %v753_v11  ;;  %v1171_v15 = vpop.f32.mrb[18].mxu1  ;;  %v834_v16 = vmax.f32 %v634_v8, 0.0  ;;  %v637_v18 = vadd.f32 %v1139_v14, %v1355_v36  ;;  %v628_v20 = vpop.f32.mrb[19].mxu0 }
 0x109   : > { %v866_v17 = vmax.f32 %v762_v9, 0.0  ;;  %v765_v19 = vadd.f32 %v1171_v15, %v1355_v36  ;;  %v756_v21 = vpop.f32.mrb[19].mxu1  ;;  %v832_v22 = vmax.f32 %v626_v12, 0.0  ;;  %v629_v24 = vadd.f32 %v1355_v36, %v628_v20 }
 0x10a   : > { %v864_v23 = vmax.f32 %v754_v13, 0.0  ;;  %v757_v25 = vadd.f32 %v1355_v36, %v756_v21  ;;  %898 = vst [vmem:[%s1363_s30 + $0x90] sm:$0xff] %v834_v16  ;;  %v835_v26 = vmax.f32 %v637_v18, 0.0 }
 0x10b   : > { %930 = vst [vmem:[%s1363_s30 + $0x190] sm:$0xff] %v866_v17  ;;  %v867_v27 = vmax.f32 %v765_v19, 0.0  ;;  %896 = vst [vmem:[%s1363_s30 + $0x80] sm:$0xff] %v832_v22  ;;  %v833_v28 = vmax.f32 %v629_v24, 0.0 }
 0x10c   : > { %928 = vst [vmem:[%s1363_s30 + $0x180] sm:$0xff] %v864_v23  ;;  %v865_v29 = vmax.f32 %v757_v25, 0.0  ;;  %899 = vst [vmem:[%s1363_s30 + $0x98] sm:$0xff] %v835_v26 }
 0x10d   : > { %931 = vst [vmem:[%s1363_s30 + $0x198] sm:$0xff] %v867_v27  ;;  %897 = vst [vmem:[%s1363_s30 + $0x88] sm:$0xff] %v833_v28  ;;  %v1142_v30 = vpop.f32.mrb[20].mxu0 }
 0x10e   : > { %929 = vst [vmem:[%s1363_s30 + $0x188] sm:$0xff] %v865_v29  ;;  %v1174_v31 = vpop.f32.mrb[20].mxu1  ;;  %v650_v32 = vadd.f32 %v1142_v30, %v1355_v36  ;;  %v641_v34 = vpop.f32.mrb[21].mxu0 }
 0x10f   : > { %v778_v33 = vadd.f32 %v1174_v31, %v1355_v36  ;;  %v769_v35 = vpop.f32.mrb[21].mxu1  ;;  %v642_v37 = vadd.f32 %v1355_v36, %v641_v34  ;;  %v1143_v39 = vpop.f32.mrb[22].mxu0 }
 0x110   : > { %v770_v38 = vadd.f32 %v1355_v36, %v769_v35  ;;  %v1175_v40 = vpop.f32.mrb[22].mxu1  ;;  %v838_v41 = vmax.f32 %v650_v32, 0.0  ;;  %v653_v43 = vadd.f32 %v1143_v39, %v1355_v36  ;;  %v644_v45 = vpop.f32.mrb[23].mxu0 }
 0x111   : > { %v870_v42 = vmax.f32 %v778_v33, 0.0  ;;  %v781_v44 = vadd.f32 %v1175_v40, %v1355_v36  ;;  %v772_v46 = vpop.f32.mrb[23].mxu1  ;;  %v836_v47 = vmax.f32 %v642_v37, 0.0  ;;  %v645_v49 = vadd.f32 %v1355_v36, %v644_v45 }
 0x112   : > { %v868_v48 = vmax.f32 %v770_v38, 0.0  ;;  %v773_v50 = vadd.f32 %v1355_v36, %v772_v46  ;;  %902 = vst [vmem:[%s1363_s30 + $0xb0] sm:$0xff] %v838_v41  ;;  %v839_v51 = vmax.f32 %v653_v43, 0.0 }
 0x113   : > { %934 = vst [vmem:[%s1363_s30 + $0x1b0] sm:$0xff] %v870_v42  ;;  %v871_v52 = vmax.f32 %v781_v44, 0.0  ;;  %900 = vst [vmem:[%s1363_s30 + $0xa0] sm:$0xff] %v836_v47  ;;  %v837_v53 = vmax.f32 %v645_v49, 0.0 }
 0x114   : > { %932 = vst [vmem:[%s1363_s30 + $0x1a0] sm:$0xff] %v868_v48  ;;  %v869_v54 = vmax.f32 %v773_v50, 0.0  ;;  %903 = vst [vmem:[%s1363_s30 + $0xb8] sm:$0xff] %v839_v51 }
 0x115   : > { %935 = vst [vmem:[%s1363_s30 + $0x1b8] sm:$0xff] %v871_v52  ;;  %901 = vst [vmem:[%s1363_s30 + $0xa8] sm:$0xff] %v837_v53  ;;  %v1146_v55 = vpop.f32.mrb[24].mxu0 }
 0x116   : > { %933 = vst [vmem:[%s1363_s30 + $0x1a8] sm:$0xff] %v869_v54  ;;  %v1178_v56 = vpop.f32.mrb[24].mxu1  ;;  %v666_v57 = vadd.f32 %v1146_v55, %v1355_v36  ;;  %v657_v59 = vpop.f32.mrb[25].mxu0 }
 0x117   : > { %v794_v58 = vadd.f32 %v1178_v56, %v1355_v36  ;;  %v785_v60 = vpop.f32.mrb[25].mxu1  ;;  %v658_v61 = vadd.f32 %v1355_v36, %v657_v59  ;;  %v1147_v63 = vpop.f32.mrb[26].mxu0 }
 0x118   : > { %v786_v62 = vadd.f32 %v1355_v36, %v785_v60  ;;  %v1179_v0 = vpop.f32.mrb[26].mxu1  ;;  %v842_v1 = vmax.f32 %v666_v57, 0.0  ;;  %v669_v3 = vadd.f32 %v1147_v63, %v1355_v36  ;;  %v660_v5 = vpop.f32.mrb[27].mxu0 }
 0x119   : > { %v874_v2 = vmax.f32 %v794_v58, 0.0  ;;  %v797_v4 = vadd.f32 %v1179_v0, %v1355_v36  ;;  %v788_v6 = vpop.f32.mrb[27].mxu1  ;;  %v840_v7 = vmax.f32 %v658_v61, 0.0  ;;  %v661_v9 = vadd.f32 %v1355_v36, %v660_v5 }
 0x11a   : > { %v872_v8 = vmax.f32 %v786_v62, 0.0  ;;  %v789_v10 = vadd.f32 %v1355_v36, %v788_v6  ;;  %906 = vst [vmem:[%s1363_s30 + $0xd0] sm:$0xff] %v842_v1  ;;  %v843_v11 = vmax.f32 %v669_v3, 0.0 }
 0x11b   : > { %938 = vst [vmem:[%s1363_s30 + $0x1d0] sm:$0xff] %v874_v2  ;;  %v875_v12 = vmax.f32 %v797_v4, 0.0  ;;  %904 = vst [vmem:[%s1363_s30 + $0xc0] sm:$0xff] %v840_v7  ;;  %v841_v13 = vmax.f32 %v661_v9, 0.0 }
 0x11c   : > { %936 = vst [vmem:[%s1363_s30 + $0x1c0] sm:$0xff] %v872_v8  ;;  %v873_v14 = vmax.f32 %v789_v10, 0.0  ;;  %907 = vst [vmem:[%s1363_s30 + $0xd8] sm:$0xff] %v843_v11 }
 0x11d   : > { %939 = vst [vmem:[%s1363_s30 + $0x1d8] sm:$0xff] %v875_v12  ;;  %905 = vst [vmem:[%s1363_s30 + $0xc8] sm:$0xff] %v841_v13  ;;  %v1150_v15 = vpop.f32.mrb[28].mxu0 }
 0x11e   : > { %937 = vst [vmem:[%s1363_s30 + $0x1c8] sm:$0xff] %v873_v14  ;;  %v1182_v16 = vpop.f32.mrb[28].mxu1  ;;  %v682_v17 = vadd.f32 %v1150_v15, %v1355_v36  ;;  %v673_v19 = vpop.f32.mrb[29].mxu0 }
 0x11f   : > { %v810_v18 = vadd.f32 %v1182_v16, %v1355_v36  ;;  %v801_v20 = vpop.f32.mrb[29].mxu1  ;;  %v674_v21 = vadd.f32 %v1355_v36, %v673_v19  ;;  %v1151_v23 = vpop.f32.mrb[30].mxu0 }
 0x120   : > { %v802_v22 = vadd.f32 %v1355_v36, %v801_v20  ;;  %v1183_v24 = vpop.f32.mrb[30].mxu1  ;;  %v846_v25 = vmax.f32 %v682_v17, 0.0  ;;  %v685_v27 = vadd.f32 %v1151_v23, %v1355_v36  ;;  %v676_v29 = vpop.f32.mrb[31].mxu0 }
 0x121   : > { %v878_v26 = vmax.f32 %v810_v18, 0.0  ;;  %v813_v28 = vadd.f32 %v1183_v24, %v1355_v36  ;;  %v804_v30 = vpop.f32.mrb[31].mxu1  ;;  %v844_v31 = vmax.f32 %v674_v21, 0.0  ;;  %v677_v33 = vadd.f32 %v1355_v36, %v676_v29 }
 0x122   : > { %v876_v32 = vmax.f32 %v802_v22, 0.0  ;;  %v805_v34 = vadd.f32 %v1355_v36, %v804_v30  ;;  %910 = vst [vmem:[%s1363_s30 + $0xf0] sm:$0xff] %v846_v25  ;;  %v847_v35 = vmax.f32 %v685_v27, 0.0 }
 0x123   : > { %942 = vst [vmem:[%s1363_s30 + $0x1f0] sm:$0xff] %v878_v26  ;;  %v879_v37 = vmax.f32 %v813_v28, 0.0  ;;  %908 = vst [vmem:[%s1363_s30 + $0xe0] sm:$0xff] %v844_v31  ;;  %v845_v38 = vmax.f32 %v677_v33, 0.0 }
 0x124   : > { %940 = vst [vmem:[%s1363_s30 + $0x1e0] sm:$0xff] %v876_v32  ;;  %v877_v39 = vmax.f32 %v805_v34, 0.0  ;;  %911 = vst [vmem:[%s1363_s30 + $0xf8] sm:$0xff] %v847_v35 }
 0x125   : > { %943 = vst [vmem:[%s1363_s30 + $0x1f8] sm:$0xff] %v879_v37  ;;  %909 = vst [vmem:[%s1363_s30 + $0xe8] sm:$0xff] %v845_v38 }
 0x126   : > { %941 = vst [vmem:[%s1363_s30 + $0x1e8] sm:$0xff] %v877_v39 }
 0x127 PF: > { %s13_s12 = sadd.s32 1, %s1241_s12  }
 0x128   : > { %p10_p4 = scmp.ge.s32.totalorder %s13_s12, 7  }
 0x12a   :  { %12 = sbr.rel (!%p10_p4) target bundleno = 1 (0x1), region = 62 }

// kernel: protonet_forward.3
= control target key start
LH: loop header
LB: loop body
LE: loop exit
PB: predicated region body
PF: predicated region fallthrough
CT: control target
= control target key end

     0   :  { %v31_v0 = vlaneseq  ;;  %v1352_v1 = vmov 1983009808   ;;  %vm195_vm0 = vcmask 1041408   ;;  %vm1110_vm1 = vcmask 1045504   ;;  %s1878_s0 = inlined_call_operand.vmem [shape: f32[2,2,2048], index: 0, kind: input, shape index: {}]   ;;  %s1879_s1 = inlined_call_operand.vmem [shape: f32[6,2048], index: 1, kind: input, shape index: {}]   ;;  %s1880_s2 = inlined_call_operand.vmem [shape: f32[6,2], index: 2, kind: output, shape index: {}]  }
   0x1   :  { %v29_v2 = vunpack.c.l.s4 %v1352_v1  ;;  %v11_v4 = vld [vmem:[%s1878_s0] sm:$0xff]  ;;  %v454_v6 = vld [vmem:[%s1879_s1 + $0x8] sm:$0x3f]  ;;  %v13_v13 = vld [vmem:[%s1878_s0 + $0x10] sm:$0xff]  ;;  %vm501_vm2 = vcmask 1041409   ;;  %vm1321_vm5 = vcmask 13312  }
   0x2   :  { %v1368_v3 = vshrl.u32 %v31_v0, 7  ;;  %v27_v7 = vcombine.high %v11_v4, %v11_v4  ;;  %598 = vmatprep.mubr.f32.mxu1 %v454_v6  ;;  %v462_v8 = vld [vmem:[%s1879_s1 + $0x48] sm:$0x3f]  ;;  %v14_v14 = vld [vmem:[%s1878_s0 + $0x18] sm:$0xff]  ;;  %v15_v16 = vld [vmem:[%s1878_s0 + $0x20] sm:$0xff]  ;;  %v61_v17 = vcombine.high %v13_v13, %v13_v13  ;;  %v1095_v22 = vmul.f32 %v454_v6, %v454_v6 }
   0x3   :  { %v30_v5 = vunpack.c.0.s8 %v29_v2  ;;  %878 = vmatprep.mubr.f32.mxu0 %v462_v8  ;;  %v12_v10 = vld [vmem:[%s1878_s0 + $0x8] sm:$0xff]  ;;  %v78_v18 = vcombine.high %v14_v14, %v14_v14  ;;  %v17_v20 = vld [vmem:[%s1878_s0 + $0x30] sm:$0xff]  ;;  %v95_v21 = vcombine.high %v15_v16, %v15_v16  ;;  %v18_v23 = vld [vmem:[%s1878_s0 + $0x38] sm:$0xff]  ;;  %v1409_v35 = vmul.f32 %v462_v8, %v462_v8 }
   0x4   :  { %1886 = vst [vmem:[#allocation2_spill] sm:$0xff] %v1368_v3  ;;  %v44_v15 = vcombine.high %v12_v10, %v12_v10  ;;  %v16_v19 = vld [vmem:[%s1878_s0 + $0x28] sm:$0xff]  ;;  %v129_v27 = vcombine.high %v17_v20, %v17_v20  ;;  %v146_v31 = vcombine.high %v18_v23, %v18_v23  ;;  %v1414_v36 = vld [vmem:[%s1879_s1] sm:$0x3f]  ;;  %v1424_v38 = vld [vmem:[%s1879_s1 + $0x18] sm:$0x3f] }
   0x5   :  { %v33_v9 = vsub.s32 %v30_v5, %v1368_v3  ;;  %v112_v26 = vcombine.high %v16_v19, %v16_v19  ;;  %1887 = vst [vmem:[#allocation3_spill] sm:$0xff] %v1409_v35  ;;  %1888 = vst [vmem:[#allocation4_spill] sm:$0xff] %v1414_v36  ;;  %v1419_v37 = vld [vmem:[%s1879_s1 + $0x40] sm:$0x3f]  ;;  %v1427_v39 = vsel %vm1110_vm1, %v1095_v22, 0.0  ;;  %v1431_v40 = vmul.f32 %v1414_v36, %v1414_v36 }
   0x6   :  { %1889 = vst [vmem:[#allocation5_spill] sm:$0xff] %v1419_v37  ;;  %1890 = vst [vmem:[#allocation6_spill] sm:$0xff] %v1424_v38  ;;  %v1435_v41 = vmul.f32 %v1419_v37, %v1419_v37  ;;  %v1439_v42 = vmul.f32 %v1424_v38, %v1424_v38  ;;  %v1448_v47 = vld [vmem:[%s1879_s1 + $0x10] sm:$0x3f] }
   0x7   :  { %v34_v11 = vrot.slane %v11_v4, %v33_v9  ;;  %v41_v12 = vrot.slane %v27_v7, %v33_v9  ;;  %v51_v28 = vrot.slane %v12_v10, %v33_v9  ;;  %v58_v29 = vrot.slane %v44_v15, %v33_v9  ;;  %1891 = vst [vmem:[#allocation7_spill] sm:$0xff] %v1427_v39 }
   0x8   :  { %v1401_v30 = vrot.slane %v13_v13, %v33_v9  ;;  %v1403_v32 = vrot.slane %v61_v17, %v33_v9  ;;  %v1405_v33 = vrot.slane %v14_v14, %v33_v9  ;;  %v1407_v34 = vrot.slane %v78_v18, %v33_v9  ;;  %1892 = vst [vmem:[#allocation8_spill] sm:$0xff] %v1431_v40 }
   0x9   :  { %v42_v24 = vcombine.high %v34_v11, %v34_v11  ;;  %v43_v25 = vcombine.high %v41_v12, %v41_v12  ;;  %1893 = vst [vmem:[#allocation9_spill] sm:$0xff] %v1435_v41  ;;  %1894 = vst [vmem:[#allocation10_spill] sm:$0xff] %v1439_v42  ;;  %v196_v43 = vsel %vm195_vm0, %v34_v11, 0.0  ;;  %v210_v45 = vsel %vm195_vm0, %v41_v12, 0.0 }
   0xa   :  { %1895 = vst [vmem:[#allocation11_spill] sm:$0xff] %v1448_v47  ;;  %v59_v48 = vcombine.high %v51_v28, %v51_v28  ;;  %v60_v49 = vcombine.high %v58_v29, %v58_v29  ;;  %v76_v50 = vcombine.high %v1401_v30, %v1401_v30  ;;  %v1454_v51 = vmul.f32 %v1448_v47, %v1448_v47 }
   0xb   :  { %v203_v44 = vsel %vm195_vm0, %v42_v24, 0.0  ;;  %v217_v46 = vsel %vm195_vm0, %v43_v25, 0.0  ;;  %v77_v52 = vcombine.high %v1403_v32, %v1403_v32  ;;  %v93_v53 = vcombine.high %v1405_v33, %v1405_v33 }
   0xc   :  { %1896 = vst [vmem:[#allocation12_spill] sm:$0xff] %v1454_v51  ;;  %v94_v54 = vcombine.high %v1407_v34, %v1407_v34  ;;  %v224_v55 = vsel %vm195_vm0, %v51_v28, 0.0  ;;  %v197_v56 = vrot.slane %v196_v43, 4  ;;  %v204_v57 = vrot.slane %v203_v44, 4 }
   0xd   :  { %v211_v58 = vrot.slane %v210_v45, 4  ;;  %v218_v59 = vrot.slane %v217_v46, 4  ;;  %v1463_v60 = vrot.slane %v15_v16, %v33_v9  ;;  %v1465_v61 = vrot.slane %v95_v21, %v33_v9 }
   0xe   :  { %v1467_v62 = vrot.slane %v16_v19, %v33_v9  ;;  %v1469_v63 = vrot.slane %v112_v26, %v33_v9  ;;  %v1471_v0 = vrot.slane %v17_v20, %v33_v9  ;;  %v1473_v1 = vrot.slane %v129_v27, %v33_v9 }
   0xf   :  { %v1475_v2 = vrot.slane %v18_v23, %v33_v9  ;;  %v225_v4 = vrot.slane %v224_v55, 4  ;;  %v1477_v5 = vrot.slane %v146_v31, %v33_v9  ;;  %v231_v6 = vsel %vm195_vm0, %v59_v48, 0.0 }
  0x10   :  { %v238_v7 = vsel %vm195_vm0, %v58_v29, 0.0  ;;  %v245_v8 = vsel %vm195_vm0, %v60_v49, 0.0  ;;  %v198_v10 = vadd.f32 %v197_v56, %v196_v43  ;;  %v205_v11 = vadd.f32 %v204_v57, %v203_v44 }
  0x11   :  { %v212_v12 = vadd.f32 %v211_v58, %v210_v45  ;;  %v219_v13 = vadd.f32 %v218_v59, %v217_v46  ;;  %v226_v17 = vadd.f32 %v225_v4, %v224_v55  ;;  %v232_v18 = vrot.slane %v231_v6, 4 }
  0x12   :  { %v239_v19 = vrot.slane %v238_v7, 4  ;;  %v246_v20 = vrot.slane %v245_v8, 4  ;;  %v199_v25 = vrot.slane %v198_v10, 2  ;;  %v206_v26 = vrot.slane %v205_v11, 2 }
  0x13   :  { %v213_v27 = vrot.slane %v212_v12, 2  ;;  %v220_v28 = vrot.slane %v219_v13, 2  ;;  %v252_v29 = vsel %vm195_vm0, %v1401_v30, 0.0  ;;  %v259_v31 = vsel %vm195_vm0, %v76_v50, 0.0 }
  0x14   :  { %v266_v43 = vsel %vm195_vm0, %v1403_v32, 0.0  ;;  %v273_v44 = vsel %vm195_vm0, %v77_v52, 0.0  ;;  %v227_v45 = vrot.slane %v226_v17, 2  ;;  %v233_v46 = vadd.f32 %v232_v18, %v231_v6 }
  0x15   :  { %v240_v48 = vadd.f32 %v239_v19, %v238_v7  ;;  %v247_v49 = vadd.f32 %v246_v20, %v245_v8  ;;  %v253_v55 = vrot.slane %v252_v29, 4  ;;  %v260_v56 = vrot.slane %v259_v31, 4 }
  0x16   :  { %v267_v57 = vrot.slane %v266_v43, 4  ;;  %v274_v58 = vrot.slane %v273_v44, 4  ;;  %v280_v59 = vsel %vm195_vm0, %v1405_v33, 0.0  ;;  %v287_v30 = vsel %vm195_vm0, %v93_v53, 0.0 }
  0x17   :  { %v294_v50 = vsel %vm195_vm0, %v1407_v34, 0.0  ;;  %v301_v32 = vsel %vm195_vm0, %v94_v54, 0.0  ;;  %v200_v4 = vadd.f32 %v199_v25, %v198_v10  ;;  %v207_v52 = vadd.f32 %v206_v26, %v205_v11 }
  0x18   :  { %v214_v24 = vadd.f32 %v213_v27, %v212_v12  ;;  %v221_v6 = vadd.f32 %v220_v28, %v219_v13  ;;  %v234_v7 = vrot.slane %v233_v46, 2  ;;  %v281_v8 = vrot.slane %v280_v59, 4 }
  0x19   :  { %v288_v18 = vrot.slane %v287_v30, 4  ;;  %v295_v19 = vrot.slane %v294_v50, 4  ;;  %v228_v20 = vadd.f32 %v227_v45, %v226_v17  ;;  %v241_v23 = vrot.slane %v240_v48, 2 }
  0x1a   :  { %v248_v22 = vrot.slane %v247_v49, 2  ;;  %v302_v21 = vrot.slane %v301_v32, 4  ;;  %v254_v33 = vadd.f32 %v253_v55, %v252_v29  ;;  %v261_v16 = vadd.f32 %v260_v56, %v259_v31 }
  0x1b   :  { %v268_v53 = vadd.f32 %v267_v57, %v266_v43  ;;  %v275_v9 = vadd.f32 %v274_v58, %v273_v44  ;;  %v201_v15 = vrot.slane %v200_v4, 1  ;;  %v208_v34 = vrot.slane %v207_v52, 1 }
  0x1c   :  { %v215_v14 = vrot.slane %v214_v24, 1  ;;  %v222_v54 = vrot.slane %v221_v6, 1  ;;  %v235_v10 = vadd.f32 %v234_v7, %v233_v46  ;;  %v282_v11 = vadd.f32 %v281_v8, %v280_v59 }
  0x1d   :  { %v289_v12 = vadd.f32 %v288_v18, %v287_v30  ;;  %v296_v13 = vadd.f32 %v295_v19, %v294_v50  ;;  %v229_v25 = vrot.slane %v228_v20, 1  ;;  %v242_v26 = vadd.f32 %v241_v23, %v240_v48 }
  0x1e   :  { %v249_v27 = vadd.f32 %v248_v22, %v247_v49  ;;  %v303_v28 = vadd.f32 %v302_v21, %v301_v32  ;;  %v255_v17 = vrot.slane %v254_v33, 2  ;;  %v262_v45 = vrot.slane %v261_v16, 2 }
  0x1f   :  { %v269_v3 = vrot.slane %v268_v53, 2  ;;  %v276_v35 = vrot.slane %v275_v9, 2  ;;  %v1510_v29 = vadd.f32 %v201_v15, %v200_v4  ;;  %v1512_v31 = vadd.f32 %v208_v34, %v207_v52 }
  0x20   :  { %v1514_v43 = vadd.f32 %v215_v14, %v214_v24  ;;  %v1516_v44 = vadd.f32 %v222_v54, %v221_v6  ;;  %v236_v46 = vrot.slane %v235_v10, 1  ;;  %v283_v55 = vrot.slane %v282_v11, 2 }
  0x21   :  { %v290_v56 = vrot.slane %v289_v12, 2  ;;  %v297_v57 = vrot.slane %v296_v13, 2  ;;  %v1518_v58 = vadd.f32 %v229_v25, %v228_v20  ;;  %v243_v22 = vrot.slane %v242_v26, 1 }
  0x22   :  { %v250_v21 = vrot.slane %v249_v27, 1  ;;  %v304_v23 = vrot.slane %v303_v28, 2  ;;  %v256_v48 = vadd.f32 %v255_v17, %v254_v33  ;;  %v263_v49 = vadd.f32 %v262_v45, %v261_v16 }
  0x23   :  { %v270_v59 = vadd.f32 %v269_v3, %v268_v53  ;;  %v277_v15 = vadd.f32 %v276_v35, %v275_v9  ;;  %v308_v30 = vsel %vm195_vm0, %v1463_v60, 0.0  ;;  %v1897_v14 = vcombine.high %v1463_v60, %v1463_v60 }
  0x24   :  { %v322_v50 = vsel %vm195_vm0, %v1465_v61, 0.0  ;;  %v1898_v32 = vcombine.high %v1465_v61, %v1465_v61  ;;  %v1532_v52 = vadd.f32 %v236_v46, %v235_v10  ;;  %v284_v3 = vadd.f32 %v283_v55, %v282_v11 }
  0x25   :  { %v315_v24 = vsel %vm195_vm0, %v1897_v14, 0.0  ;;  %v291_v35 = vadd.f32 %v290_v56, %v289_v12  ;;  %v298_v9 = vadd.f32 %v297_v57, %v296_v13  ;;  %v1534_v16 = vadd.f32 %v243_v22, %v242_v26 }
  0x26   :  { %v329_v4 = vsel %vm195_vm0, %v1898_v32, 0.0  ;;  %v1536_v6 = vadd.f32 %v250_v21, %v249_v27  ;;  %v305_v60 = vadd.f32 %v304_v23, %v303_v28  ;;  %v336_v7 = vsel %vm195_vm0, %v1467_v62, 0.0 }
  0x27   :  { %v309_v8 = vrot.slane %v308_v30, 4  ;;  %v316_v18 = vrot.slane %v315_v24, 4  ;;  %v323_v19 = vrot.slane %v322_v50, 4  ;;  %v330_v20 = vrot.slane %v329_v4, 4 }
  0x28   :  { %v257_v61 = vrot.slane %v256_v48, 1  ;;  %v264_v33 = vrot.slane %v263_v49, 1  ;;  %v271_v53 = vrot.slane %v270_v59, 1  ;;  %v278_v34 = vrot.slane %v277_v15, 1 }
  0x29   :  { %v285_v54 = vrot.slane %v284_v3, 1  ;;  %v292_v10 = vrot.slane %v291_v35, 1  ;;  %v299_v11 = vrot.slane %v298_v9, 1  ;;  %v337_v12 = vrot.slane %v336_v7, 4 }
  0x2a   :  { %v306_v13 = vrot.slane %v305_v60, 1  ;;  %v1899_v25 = vcombine.high %v1467_v62, %v1467_v62  ;;  %v350_v27 = vsel %vm195_vm0, %v1469_v63, 0.0  ;;  %v1900_v28 = vcombine.high %v1469_v63, %v1469_v63 }
  0x2b   :  { %v310_v45 = vadd.f32 %v309_v8, %v308_v30  ;;  %v317_v46 = vadd.f32 %v316_v18, %v315_v24  ;;  %v324_v55 = vadd.f32 %v323_v19, %v322_v50  ;;  %v331_v56 = vadd.f32 %v330_v20, %v329_v4 }
  0x2c   :  { %v343_v26 = vsel %vm195_vm0, %v1899_v25, 0.0  ;;  %v357_v17 = vsel %vm195_vm0, %v1900_v28, 0.0  ;;  %v1550_v57 = vadd.f32 %v257_v61, %v256_v48  ;;  %v1552_v22 = vadd.f32 %v264_v33, %v263_v49 }
  0x2d   :  { %v1554_v21 = vadd.f32 %v271_v53, %v270_v59  ;;  %v1556_v62 = vadd.f32 %v278_v34, %v277_v15  ;;  %v338_v23 = vadd.f32 %v337_v12, %v336_v7  ;;  %v344_v14 = vrot.slane %v343_v26, 4 }
  0x2e   :  { %v351_v32 = vrot.slane %v350_v27, 4  ;;  %v358_v25 = vrot.slane %v357_v17, 4  ;;  %v1558_v41 = vadd.f32 %v285_v54, %v284_v3  ;;  %v1560_v63 = vadd.f32 %v292_v10, %v291_v35 }
  0x2f   :  { %v1562_v30 = vadd.f32 %v299_v11, %v298_v9  ;;  %v1564_v24 = vadd.f32 %v306_v13, %v305_v60  ;;  %v311_v48 = vrot.slane %v310_v45, 2  ;;  %v318_v50 = vrot.slane %v317_v46, 2 }
  0x30   :  { %v325_v49 = vrot.slane %v324_v55, 2  ;;  %v332_v4 = vrot.slane %v331_v56, 2  ;;  %v364_v59 = vsel %vm195_vm0, %v1471_v0, 0.0  ;;  %v1902_v15 = vcombine.high %v1471_v0, %v1471_v0 }
  0x31   :  { %1901 = vst [vmem:[#allocation13_spill] sm:$0xff] %v1564_v24  ;;  %v378_v3 = vsel %vm195_vm0, %v1473_v1, 0.0  ;;  %v1903_v35 = vcombine.high %v1473_v1, %v1473_v1  ;;  %v339_v60 = vrot.slane %v338_v23, 2  ;;  %v345_v8 = vadd.f32 %v344_v14, %v343_v26 }
  0x32   :  { %v371_v7 = vsel %vm195_vm0, %v1902_v15, 0.0  ;;  %v352_v18 = vadd.f32 %v351_v32, %v350_v27  ;;  %v359_v19 = vadd.f32 %v358_v25, %v357_v17  ;;  %v365_v20 = vrot.slane %v364_v59, 4 }
  0x33   :  { %v385_v9 = vsel %vm195_vm0, %v1903_v35, 0.0  ;;  %v372_v61 = vrot.slane %v371_v7, 4  ;;  %v379_v33 = vrot.slane %v378_v3, 4  ;;  %v392_v0 = vsel %vm195_vm0, %v1475_v2, 0.0 }
  0x34   :  { %v386_v53 = vrot.slane %v385_v9, 4  ;;  %v1904_v34 = vcombine.high %v1475_v2, %v1475_v2  ;;  %v406_v1 = vsel %vm195_vm0, %v1477_v5, 0.0  ;;  %v1905_v10 = vcombine.high %v1477_v5, %v1477_v5 }
  0x35   :  { %v366_v12 = vadd.f32 %v365_v20, %v364_v59  ;;  %v373_v13 = vadd.f32 %v372_v61, %v371_v7  ;;  %v380_v26 = vadd.f32 %v379_v33, %v378_v3  ;;  %v393_v28 = vrot.slane %v392_v0, 4 }
  0x36   :  { %v399_v54 = vsel %vm195_vm0, %v1904_v34, 0.0  ;;  %v413_v11 = vsel %vm195_vm0, %v1905_v10, 0.0  ;;  %v387_v27 = vadd.f32 %v386_v53, %v385_v9  ;;  %v407_v14 = vrot.slane %v406_v1, 4 }
  0x37   :  { %v400_v17 = vrot.slane %v399_v54, 4  ;;  %v414_v32 = vrot.slane %v413_v11, 4  ;;  %v346_v25 = vrot.slane %v345_v8, 2  ;;  %v353_v2 = vrot.slane %v352_v18, 2 }
  0x38   :  { %v360_v15 = vrot.slane %v359_v19, 2  ;;  %v367_v35 = vrot.slane %v366_v12, 2  ;;  %v394_v34 = vadd.f32 %v393_v28, %v392_v0  ;;  %v408_v38 = vadd.f32 %v407_v14, %v406_v1 }
  0x39   :  { %v401_v47 = vadd.f32 %v400_v17, %v399_v54  ;;  %v415_v37 = vadd.f32 %v414_v32, %v413_v11  ;;  %v312_v36 = vadd.f32 %v311_v48, %v310_v45  ;;  %v374_v5 = vrot.slane %v373_v13, 2 }
  0x3a   :  { %v381_v51 = vrot.slane %v380_v26, 2  ;;  %v388_v10 = vrot.slane %v387_v27, 2  ;;  %v319_v59 = vadd.f32 %v318_v50, %v317_v46  ;;  %v326_v7 = vadd.f32 %v325_v49, %v324_v55 }
  0x3b   :  { %v333_v3 = vadd.f32 %v332_v4, %v331_v56  ;;  %v395_v9 = vrot.slane %v394_v34, 2  ;;  %v340_v20 = vadd.f32 %v339_v60, %v338_v23  ;;  %v402_v61 = vrot.slane %v401_v47, 2 }
  0x3c   :  { %v409_v33 = vrot.slane %v408_v38, 2  ;;  %v416_v53 = vrot.slane %v415_v37, 2  ;;  %v347_v42 = vadd.f32 %v346_v25, %v345_v8  ;;  %v354_v39 = vadd.f32 %v353_v2, %v352_v18 }
  0x3d   :  { %v361_v40 = vadd.f32 %v360_v15, %v359_v19  ;;  %v368_v24 = vadd.f32 %v367_v35, %v366_v12  ;;  %v313_v0 = vrot.slane %v312_v36, 1  ;;  %v375_v54 = vadd.f32 %v374_v5, %v373_v13 }
  0x3e   :  { %v382_v1 = vadd.f32 %v381_v51, %v380_v26  ;;  %v389_v11 = vadd.f32 %v388_v10, %v387_v27  ;;  %v320_v45 = vrot.slane %v319_v59, 1  ;;  %v327_v48 = vrot.slane %v326_v7, 1 }
  0x3f   :  { %v334_v28 = vrot.slane %v333_v3, 1  ;;  %v396_v17 = vadd.f32 %v395_v9, %v394_v34  ;;  %v341_v46 = vrot.slane %v340_v20, 1  ;;  %v403_v55 = vadd.f32 %v402_v61, %v401_v47 }
  0x40   :  { %v410_v56 = vadd.f32 %v409_v33, %v408_v38  ;;  %v417_v50 = vadd.f32 %v416_v53, %v415_v37  ;;  %v348_v23 = vrot.slane %v347_v42, 1  ;;  %v355_v49 = vrot.slane %v354_v39, 1  ;;  %v1906_v33 = vld [vmem:[#allocation13_spill] sm:$0xff] }
  0x41   :  { %v362_v4 = vrot.slane %v361_v40, 1  ;;  %v369_v60 = vrot.slane %v368_v24, 1  ;;  %v314_v8 = vadd.f32 %v313_v0, %v312_v36  ;;  %v376_v18 = vrot.slane %v375_v54, 1 }
  0x42   :  { %v383_v19 = vrot.slane %v382_v1, 1  ;;  %v390_v12 = vrot.slane %v389_v11, 1  ;;  %v321_v14 = vadd.f32 %v320_v45, %v319_v59  ;;  %v328_v13 = vadd.f32 %v327_v48, %v326_v7 }
  0x43   :  { %v335_v51 = vadd.f32 %v334_v28, %v333_v3  ;;  %v397_v26 = vrot.slane %v396_v17, 1  ;;  %v342_v27 = vadd.f32 %v341_v46, %v340_v20  ;;  %v404_v32 = vrot.slane %v403_v55, 1 }
  0x44   :  { %v411_v25 = vrot.slane %v410_v56, 1  ;;  %v418_v2 = vrot.slane %v417_v50, 1  ;;  %v349_v15 = vadd.f32 %v348_v23, %v347_v42  ;;  %v356_v47 = vadd.f32 %v355_v49, %v354_v39 }
  0x45   :  { %v363_v38 = vadd.f32 %v362_v4, %v361_v40  ;;  %v370_v37 = vadd.f32 %v369_v60, %v368_v24  ;;  %v377_v35 = vadd.f32 %v376_v18, %v375_v54  ;;  %v384_v34 = vadd.f32 %v383_v19, %v382_v1 }
  0x46   :  { %v391_v5 = vadd.f32 %v390_v12, %v389_v11  ;;  %v1591_v36 = vmul.f32 0.5, %v1510_v29  ;;  %v1593_v10 = vadd.f32 %v397_v26, %v396_v17  ;;  %v1596_v59 = vmul.f32 0.5, %v1512_v31 }
  0x47   :  { %v1599_v7 = vmul.f32 0.5, %v1514_v43  ;;  %v1602_v3 = vmul.f32 0.5, %v1516_v44  ;;  %v1604_v39 = vadd.f32 %v404_v32, %v403_v55  ;;  %v1606_v40 = vadd.f32 %v411_v25, %v410_v56 }
  0x48   :  { %v1608_v42 = vadd.f32 %v418_v2, %v417_v50  ;;  %v1611_v29 = vmul.f32 0.5, %v1518_v58  ;;  %v1614_v24 = vmul.f32 0.5, %v1532_v52  ;;  %v1617_v31 = vmul.f32 0.5, %v1534_v16 }
  0x49   :  { %v1620_v43 = vmul.f32 0.5, %v1536_v6  ;;  %v1623_v44 = vmul.f32 0.5, %v1550_v57  ;;  %v1626_v9 = vmul.f32 0.5, %v1552_v22  ;;  %v1628_v20 = vmul.f32 0.5, %v314_v8 }
  0x4a   :  { %v438_v61 = vmul.f32 0.5, %v321_v14  ;;  %v1630_v58 = vmul.f32 0.5, %v328_v13  ;;  %v1633_v52 = vmul.f32 0.5, %v1554_v21  ;;  %v1636_v16 = vmul.f32 0.5, %v1556_v62 }
  0x4b   :  { %v1639_v6 = vmul.f32 0.5, %v1558_v41  ;;  %v1642_v57 = vmul.f32 0.5, %v1560_v63  ;;  %v1645_v22 = vmul.f32 0.5, %v1562_v30  ;;  %v1648_v53 = vmul.f32 0.5, %v1906_v33 }
  0x4c   :  { %v1650_v0 = vmul.f32 0.5, %v335_v51  ;;  %v1652_v54 = vmul.f32 0.5, %v342_v27  ;;  %v1654_v21 = vmul.f32 0.5, %v349_v15  ;;  %v1656_v62 = vmul.f32 0.5, %v356_v47 }
  0x4d   :  { %v1144_v41 = vmul.f32 %v1591_v36, %v1591_v36  ;;  %v1145_v63 = vmul.f32 %v1596_v59, %v1596_v59  ;;  %v1146_v30 = vmul.f32 %v1599_v7, %v1599_v7  ;;  %v1160_v1 = vmul.f32 %v1628_v20, %v1628_v20 }
  0x4e   :  { %v1161_v11 = vmul.f32 %v438_v61, %v438_v61  ;;  %v1162_v45 = vmul.f32 %v1630_v58, %v1630_v58  ;;  %v1668_v48 = vmul.f32 0.5, %v363_v38  ;;  %v445_v28 = vmul.f32 0.5, %v370_v37 }
  0x4f   :  { %v446_v17 = vmul.f32 0.5, %v377_v35  ;;  %v447_v46 = vmul.f32 0.5, %v384_v34  ;;  %v448_v55 = vmul.f32 0.5, %v391_v5  ;;  %v1147_v56 = vmul.f32 %v1602_v3, %v1602_v3 }
  0x50   :  { %v1148_v50 = vmul.f32 %v1611_v29, %v1611_v29  ;;  %v1163_v23 = vmul.f32 %v1650_v0, %v1650_v0  ;;  %v1149_v49 = vmul.f32 %v1614_v24, %v1614_v24  ;;  %v1150_v4 = vmul.f32 %v1617_v31, %v1617_v31 }
  0x51   :  { %v1151_v60 = vmul.f32 %v1620_v43, %v1620_v43  ;;  %v1152_v8 = vmul.f32 %v1623_v44, %v1623_v44  ;;  %v1164_v18 = vmul.f32 %v1652_v54, %v1652_v54  ;;  %v1208_v19 = vsel %vm501_vm2, %v1160_v1, %v1144_v41 }
  0x52   :  { %v1209_v12 = vsel %vm501_vm2, %v1161_v11, %v1145_v63  ;;  %v1210_v14 = vsel %vm501_vm2, %v1162_v45, %v1146_v30  ;;  %v1153_v13 = vmul.f32 %v1626_v9, %v1626_v9  ;;  %v1693_v51 = vmul.f32 %v1633_v52, %v1633_v52 }
  0x53   :  { %v1697_v26 = vmul.f32 %v1636_v16, %v1636_v16  ;;  %v1701_v27 = vmul.f32 %v1639_v6, %v1639_v6  ;;  %v1165_v32 = vmul.f32 %v1654_v21, %v1654_v21  ;;  %v1166_v25 = vmul.f32 %v1656_v62, %v1656_v62 }
  0x54   :  { %v1167_v2 = vmul.f32 %v1668_v48, %v1668_v48  ;;  %v1211_v15 = vsel %vm501_vm2, %v1163_v23, %v1147_v56  ;;  %v1168_v47 = vmul.f32 %v445_v28, %v445_v28  ;;  %v1240_v38 = vsel %vm195_vm0, %v1208_v19, 0.0 }
  0x55   :  { %v1241_v37 = vsel %vm195_vm0, %v1209_v12, 0.0  ;;  %v1243_v35 = vsel %vm195_vm0, %v1210_v14, 0.0  ;;  %v1715_v34 = vmul.f32 %v1642_v57, %v1642_v57  ;;  %v1719_v5 = vmul.f32 %v1645_v22, %v1645_v22 }
  0x56   :  { %v1212_v33 = vsel %vm501_vm2, %v1164_v18, %v1148_v50  ;;  %v1242_v41 = vadd.f32 %v1241_v37, %v1240_v38  ;;  %v1169_v63 = vmul.f32 %v446_v17, %v446_v17  ;;  %v1170_v30 = vmul.f32 %v447_v46, %v447_v46 }
  0x57   :  { %v1171_v1 = vmul.f32 %v448_v55, %v448_v55  ;;  %v1245_v11 = vsel %vm195_vm0, %v1211_v15, 0.0  ;;  %v1213_v45 = vsel %vm501_vm2, %v1165_v32, %v1149_v49  ;;  %v1214_v56 = vsel %vm501_vm2, %v1166_v25, %v1150_v4 }
  0x58   :  { %v1215_v23 = vsel %vm501_vm2, %v1167_v2, %v1151_v60  ;;  %v1244_v19 = vadd.f32 %v1243_v35, %v1242_v41  ;;  %v1216_v12 = vsel %vm501_vm2, %v1168_v47, %v1152_v8  ;;  %v1247_v14 = vsel %vm195_vm0, %v1212_v33, 0.0  ;;  %v1912_v2 = vld [vmem:[#allocation5_spill] sm:$0xff]  ;;  %v458_v33 = vld [vmem:[%s1879_s1 + $0x28] sm:$0x3f] }
  0x59   :  { %v503_v50 = vsel %vm501_vm2, %v438_v61, %v1596_v59  ;;  %v511_v18 = vsel %vm501_vm2, %v446_v17, %v1626_v9  ;;  %v449_v38 = vmul.f32 0.5, %v1593_v10  ;;  %v502_v49 = vsel %vm501_vm2, %v1628_v20, %v1591_v36  ;;  %v1907_v59 = vld [vmem:[#allocation8_spill] sm:$0xff]  ;;  %v1908_v20 = vld [vmem:[#allocation7_spill] sm:$0xff] }
  0x5a   :  { %v1246_v15 = vadd.f32 %v1245_v11, %v1244_v19  ;;  %534 = vmatprep.subr.mxu1 %v503_v50  ;;  %814 = vmatprep.subr.mxu0 %v511_v18  ;;  %v510_v4 = vsel %vm501_vm2, %v445_v28, %v1623_v44  ;;  %v1249_v60 = vsel %vm195_vm0, %v1213_v45, 0.0  ;;  %v1111_v61 = vsel %vm1110_vm1, %v1907_v59, 0.0  ;;  %v463_v18 = vld [vmem:[%s1879_s1 + $0x50] sm:$0x3f] }
  0x5b   :  { %535 = vmatpush1.xpose.msra.mxu1 %v502_v49  ;;  %815 = vmatpush1.xpose.msra.mxu0 %v510_v4  ;;  %v505_v10 = vsel %vm501_vm2, %v1650_v0, %v1602_v3  ;;  %v513_v9 = vsel %vm501_vm2, %v448_v55, %v1636_v16  ;;  %v450_v17 = vmul.f32 0.5, %v1604_v39  ;;  %v1113_v8 = vadd.f32 %v1908_v20, %v1111_v61  ;;  %v1909_v3 = vld [vmem:[#allocation10_spill] sm:$0xff]  ;;  %v1759_v39 = vld [vmem:[%s1879_s1 + $0x58] sm:$0x3f]  ;;  %v1910_v16 = vld [vmem:[#allocation12_spill] sm:$0xff] }
  0x5c   :  { %v1248_v36 = vadd.f32 %v1247_v14, %v1246_v15  ;;  %604 = vmatprep.subr.mxu1 %v505_v10  ;;  %884 = vmatprep.subr.mxu0 %v513_v9  ;;  %v504_v44 = vsel %vm501_vm2, %v1630_v58, %v1599_v7  ;;  %v1251_v28 = vsel %vm195_vm0, %v1214_v56, 0.0  ;;  %v512_v32 = vsel %vm501_vm2, %v447_v46, %v1633_v52  ;;  %v1911_v58 = vld [vmem:[#allocation4_spill] sm:$0xff]  ;;  %v466_v61 = vld [vmem:[%s1879_s1 + $0x68] sm:$0x3f] }
  0x5d   :  { %v1116_v0 = vsel %vm1110_vm1, %v1909_v3, 0.0  ;;  %v1114_v55 = vsel %vm1110_vm1, %v1910_v16, 0.0  ;;  %v1764_v25 = vmul.f32 0.5, %v1606_v40  ;;  %v507_v46 = vsel %vm501_vm2, %v1654_v21, %v1614_v24  ;;  %v1913_v21 = vld [vmem:[#allocation6_spill] sm:$0xff]  ;;  %v1816_v59 = vld [vmem:[%s1879_s1 + $0x30] sm:$0x3f] }
  0x5e   :  { %v1250_v7 = vadd.f32 %v1249_v60, %v1248_v36  ;;  %599 = vmatmul.mubr.f32.vlgmr.msra.gmra.mrb[0].mxu1 %v1911_v58  ;;  %879 = vmatmul.mubr.f32.vlgmr.msra.gmra.mrb[0].mxu0 %v1912_v2  ;;  %v1115_v52 = vadd.f32 %v1114_v55, %v1113_v8  ;;  %v1773_v47 = vmul.f32 %v1648_v53, %v1648_v53  ;;  %v1253_v35 = vsel %vm195_vm0, %v1215_v23, 0.0  ;;  %v1914_v9 = vld [vmem:[#allocation11_spill] sm:$0xff]  ;;  %v1915_v3 = vld [vmem:[#allocation9_spill] sm:$0xff] }
  0x5f   :  { %v1217_v37 = vsel %vm501_vm2, %v1169_v63, %v1153_v13  ;;  %605 = vmatpush1.xpose.msra.mxu1 %v504_v44  ;;  %885 = vmatpush1.xpose.msra.mxu0 %v512_v32  ;;  %v515_v40 = vsel %vm501_vm2, %v450_v17, %v1642_v57  ;;  %v452_v41 = vmul.f32 0.5, %v1608_v42  ;;  %v1099_v13 = vmul.f32 %v458_v33, %v458_v33  ;;  %v1788_v63 = vld [vmem:[%s1879_s1 + $0x20] sm:$0x3f]  ;;  %v1916_v2 = vld [vmem:[#allocation3_spill] sm:$0xff] }
  0x60   :  { %v1252_v24 = vadd.f32 %v1251_v28, %v1250_v7  ;;  %668 = vmatprep.mubr.f32.mxu1 %v1913_v21  ;;  %948 = vmatprep.mubr.f32.mxu0 %v1759_v39  ;;  %v1117_v11 = vadd.f32 %v1116_v0, %v1115_v52  ;;  %v1172_v45 = vmul.f32 %v449_v38, %v449_v38  ;;  %v1255_v56 = vsel %vm195_vm0, %v1216_v12, 0.0 }
  0x61   :  { %v1173_v57 = vmul.f32 %v450_v17, %v450_v17  ;;  %674 = vmatprep.subr.mxu1 %v507_v46  ;;  %954 = vmatprep.subr.mxu0 %v515_v40  ;;  %v1098_v42 = vmul.f32 %v1788_v63, %v1788_v63  ;;  %v1174_v23 = vmul.f32 %v1764_v25, %v1764_v25  ;;  %v1257_v12 = vsel %vm195_vm0, %v1217_v37, 0.0  ;;  %v465_v37 = vld [vmem:[%s1879_s1 + $0x60] sm:$0x3f] }
  0x62   :  { %v1218_v19 = vsel %vm501_vm2, %v1170_v30, %v1693_v51  ;;  %v1219_v14 = vsel %vm501_vm2, %v1171_v1, %v1697_v26  ;;  %v1254_v50 = vadd.f32 %v1253_v35, %v1252_v24  ;;  %v506_v15 = vsel %vm501_vm2, %v1652_v54, %v1611_v29  ;;  %v460_v51 = vld [vmem:[%s1879_s1 + $0x38] sm:$0x3f] }
  0x63   :  { %v1120_v49 = vsel %vm1110_vm1, %v1099_v13, 0.0  ;;  %v1118_v4 = vsel %vm1110_vm1, %v1098_v42, 0.0  ;;  %v514_v30 = vsel %vm501_vm2, %v449_v38, %v1639_v6  ;;  %v1101_v60 = vmul.f32 %v460_v51, %v460_v51  ;;  %v467_v13 = vld [vmem:[%s1879_s1 + $0x70] sm:$0x3f] }
  0x64   :  { %v1256_v26 = vadd.f32 %v1255_v56, %v1254_v50  ;;  %v1119_v1 = vadd.f32 %v1118_v4, %v1117_v11  ;;  %v1220_v29 = vsel %vm501_vm2, %v1172_v45, %v1701_v27  ;;  %v1259_v54 = vsel %vm195_vm0, %v1218_v19, 0.0 }
  0x65   :  { %v509_v6 = vsel %vm501_vm2, %v1668_v48, %v1620_v43  ;;  %v1100_v38 = vmul.f32 %v1816_v59, %v1816_v59  ;;  %v517_v27 = vsel %vm501_vm2, %v452_v41, %v1648_v53  ;;  %v1175_v36 = vmul.f32 %v452_v41, %v452_v41 }
  0x66   :  { %v1258_v10 = vadd.f32 %v1257_v12, %v1256_v26  ;;  %669 = vmatmul.mubr.f32.vlgmr.msra.gmra.mrb[0].mxu1 %v1914_v9  ;;  %949 = vmatmul.mubr.f32.vlgmr.msra.gmra.mrb[0].mxu0 %v463_v18  ;;  %v1121_v17 = vadd.f32 %v1120_v49, %v1119_v1  ;;  %v1261_v20 = vsel %vm195_vm0, %v1219_v14, 0.0  ;;  %v1124_v8 = vsel %vm1110_vm1, %v1101_v60, 0.0 }
  0x67   :  { %675 = vmatpush1.xpose.msra.mxu1 %v506_v15  ;;  %955 = vmatpush1.xpose.msra.mxu0 %v514_v30  ;;  %v1122_v43 = vsel %vm1110_vm1, %v1100_v38, 0.0  ;;  %v1221_v48 = vsel %vm501_vm2, %v1173_v57, %v1715_v34  ;;  %v1263_v32 = vsel %vm195_vm0, %v1220_v29, 0.0  ;;  %v1126_v53 = vsel %vm1110_vm1, %v1915_v3, 0.0  ;;  %v1917_v29 = vld [vmem:[#allocation2_spill] sm:$0xff] }
  0x68   :  { %v1260_v44 = vadd.f32 %v1259_v54, %v1258_v10  ;;  %738 = vmatprep.mubr.f32.mxu1 %v458_v33  ;;  %1018 = vmatprep.mubr.f32.mxu0 %v466_v61  ;;  %v1123_v28 = vadd.f32 %v1122_v43, %v1121_v17  ;;  %v1104_v0 = vmul.f32 %v463_v18, %v463_v18  ;;  %v1265_v58 = vsel %vm195_vm0, %v1221_v48, 0.0 }
  0x69   :  { %744 = vmatprep.subr.mxu1 %v509_v6  ;;  %1024 = vmatprep.subr.mxu0 %v517_v27  ;;  %v1222_v16 = vsel %vm501_vm2, %v1174_v23, %v1719_v5  ;;  %v1223_v34 = vsel %vm501_vm2, %v1175_v36, %v1773_v47  ;;  %v1128_v52 = vsel %vm1110_vm1, %v1916_v2, 0.0  ;;  %v1105_v46 = vmul.f32 %v1759_v39, %v1759_v39  ;;  %v468_v39 = vld [vmem:[%s1879_s1 + $0x78] sm:$0x3f] }
  0x6a   :  { %v1262_v55 = vadd.f32 %v1261_v20, %v1260_v44  ;;  %v1125_v7 = vadd.f32 %v1124_v8, %v1123_v28  ;;  %v508_v5 = vsel %vm501_vm2, %v1656_v62, %v1617_v31  ;;  %v516_v47 = vsel %vm501_vm2, %v1764_v25, %v1645_v22 }
  0x6b   :  { %v1267_v33 = vsel %vm195_vm0, %v1222_v16, 0.0  ;;  %v1130_v41 = vsel %vm1110_vm1, %v1104_v0, 0.0  ;;  %v1106_v24 = vmul.f32 %v465_v37, %v465_v37  ;;  %v1269_v31 = vsel %vm195_vm0, %v1223_v34, 0.0 }
  0x6c   :  { %v1264_v35 = vadd.f32 %v1263_v32, %v1262_v55  ;;  %v1127_v40 = vadd.f32 %v1126_v53, %v1125_v7  ;;  %v1132_v62 = vsel %vm1110_vm1, %v1105_v46, 0.0  ;;  %v1107_v22 = vmul.f32 %v466_v61, %v466_v61 }
  0x6d   :  { %v1134_v57 = vsel %vm1110_vm1, %v1106_v24, 0.0  ;;  %v1109_v19 = vmul.f32 %v468_v39, %v468_v39  ;;  %v1307_v54 = vsub.s32 0, %v1917_v29 }
  0x6e   :  { %v1266_v21 = vadd.f32 %v1265_v58, %v1264_v35  ;;  %739 = vmatmul.mubr.f32.vlgmr.msra.gmra.mrb[0].mxu1 %v1788_v63  ;;  %1019 = vmatmul.mubr.f32.vlgmr.msra.gmra.mrb[0].mxu0 %v465_v37  ;;  %v1129_v11 = vadd.f32 %v1128_v52, %v1127_v40  ;;  %v1108_v63 = vmul.f32 %v467_v13, %v467_v13  ;;  %v1136_v23 = vsel %vm1110_vm1, %v1107_v22, 0.0 }
  0x6f   :  { %745 = vmatpush1.xpose.msra.mxu1 %v508_v5  ;;  %1025 = vmatpush1.xpose.msra.mxu0 %v516_v47  ;;  %v1140_v12 = vsel %vm1110_vm1, %v1109_v19, 0.0 }
  0x70   :  { %v1268_v25 = vadd.f32 %v1267_v33, %v1266_v21  ;;  %808 = vmatprep.mubr.f32.mxu1 %v460_v51  ;;  %1088 = vmatprep.mubr.f32.mxu0 %v468_v39  ;;  %v1131_v45 = vadd.f32 %v1130_v41, %v1129_v11  ;;  %v1138_v50 = vsel %vm1110_vm1, %v1108_v63, 0.0 }
  0x72   :  { %v1270_v56 = vadd.f32 %v1269_v31, %v1268_v25  ;;  %v1133_v42 = vadd.f32 %v1132_v62, %v1131_v45 }
  0x74   :  { %1271 = vadd.xlane.f32.xlu0 %v1270_v56  ;;  %v1135_v14 = vadd.f32 %v1134_v57, %v1133_v42 }
  0x76   :  { %809 = vmatmul.mubr.f32.vlgmr.msra.gmra.mrb[0].mxu1 %v1816_v59  ;;  %1089 = vmatmul.mubr.f32.vlgmr.msra.gmra.mrb[0].mxu0 %v467_v13  ;;  %v1137_v18 = vadd.f32 %v1136_v23, %v1135_v14 }
  0x78   :  { %v1139_v15 = vadd.f32 %v1138_v50, %v1137_v18 }
  0x7a   :  { %v1141_v49 = vadd.f32 %v1140_v12, %v1139_v15 }
  0x7c   :  { %1142 = vadd.xlane.f32.xlu0 %v1141_v49 }
 0x101   :  { %v1272_v4 = vpop.xlane.xlu0 %1271 }
 0x102   :  { %1273 = vxpose.xlu1.b32.start.end [1/1] (short) (narrow) %v1272_v4, 8 }
 0x109   :  { %v1143_v6 = vpop.xlane.xlu0 %1142 }
 0x149   :  { %v810_v51 = vpop.f32.mrb[0].mxu1  ;;  %v1090_v26 = vpop.f32.mrb[0].mxu0 }
 0x14a   :  { %v1327_v30 = vadd.f32 %v1090_v26, %v810_v51  ;;  %v812_v1 = vpop.f32.mrb[1].mxu1  ;;  %v1092_v60 = vpop.f32.mrb[1].mxu0 }
 0x14c   :  { %v1310_v59 = vmul.f32 2.0, %v1327_v30 }
 0x182   :  { %v1289_v61 = vpop.trf.xlu1 }
 0x183   :  { %v1308_v38 = vrot.slane %v1289_v61, %v1307_v54 }
 0x185   :  { %v1309_v10 = vadd.f32 %v1308_v38, %v1143_v6 }
 0x187   :  { %v1311_v9 = vsub.f32 %v1309_v10, %v1310_v59 }
 0x189   :  { %v1312_v17 = vmax.f32 %v1311_v9, 0.0 }
 0x18b   :  { %1350 = vrsqrt.f32 %v1312_v17  ;;  %vm1315_vm3 = vcmp.eq.f32.partialorder %v1312_v17, inf  ;;  %v1318_v20 = vand.u32 2147483648, %v1312_v17  ;;  %vm1317_vm4 = vcmp.eq.f32.partialorder %v1312_v17, 0.0 }
 0x195   :  { %v1351_v27 = vpop.eup %1350 }
 0x196   :  { %v1314_v36 = vmul.f32 %v1351_v27, %v1312_v17 }
 0x198   :  { %v1316_v8 = vsel %vm1315_vm3, %v1312_v17, %v1314_v36 }
 0x199   :  { %v1319_v43 = vsel %vm1317_vm4, %v1318_v20, %v1316_v8 }
 0x19a   :  { %v1320_v48 = vsub.f32 0.0, %v1319_v43 }
 0x19c   :  { %1322 = vst.msk [vmem:[%s1880_s2] sm:$0x3f] %vm1321_vm5, %v1320_v48 }

</bundles_post_ra>
